<compile_context>
chip_gen: v7x
topology: tpu7x:2x2x1
jax: 0.10.0
libtpu: 0.0.40
codegen_flags: <defaults>
</compile_context>

<pallas_src>
import jax
import jax.numpy as jnp
from jax import lax
from jax.experimental import pallas as pl
from jax.experimental.pallas import tpu as pltpu


def _round_up(x, m):
    return ((x + m - 1) // m) * m


def _make_kernel(num_layers, n_pad, h_pad):
    def kernel(alpha_ref,    # SMEM scalar-prefetch: (num_layers,) f32
               conn_ref,     # VMEM: (n_pad, 1) int32   parent index per node
               h_ref,        # VMEM: (n_pad, h_pad) f32 initial embedding (this batch)
               mask_ref,     # VMEM: (n_pad, 1) f32     node mask
               ws_ref,       # VMEM: (h_pad, h_pad) bf16  W_self
               wp_ref,       # VMEM: (h_pad, h_pad) bf16  W_parent
               b_ref,        # VMEM: (1, h_pad) f32       bias
               out_ref,      # VMEM: (n_pad, h_pad) f32
               h_scratch):   # VMEM scratch: (n_pad, h_pad) f32 residual state
        # f32 residual state lives in VMEM scratch (not a loop carry).
        h_scratch[...] = h_ref[...].astype(jnp.float32)

        # ---- loop invariants, hoisted (JAX does not CSE broadcasts) ----
        col = lax.broadcasted_iota(jnp.int32, (n_pad, n_pad), 1)
        # one-hot parent matrix built in-kernel; values are exactly 0/1 in bf16
        onehot_bf = (col == conn_ref[...]).astype(jnp.bfloat16)        # (n, n)
        ws_bf = ws_ref[...]
        wp_bf = wp_ref[...]
        mask = mask_ref[...].astype(jnp.float32)                       # (n, 1)
        bias = jnp.broadcast_to(b_ref[...].astype(jnp.float32),
                                (n_pad, h_pad))                        # (n, h)

        def body(depth, carry):
            h = h_scratch[...]                                         # (n, h) f32
            h_bf = h.astype(jnp.bfloat16)
            # parent gather as a one-hot MXU matmul (exact row selection of h_bf)
            h_par_bf = jnp.dot(onehot_bf, h_bf,
                               preferred_element_type=jnp.float32
                               ).astype(jnp.bfloat16)
            new_hid = (jnp.dot(h_bf, ws_bf, preferred_element_type=jnp.float32)
                       + jnp.dot(h_par_bf, wp_bf, preferred_element_type=jnp.float32)
                       + bias)
            new_hid = jnp.tanh(new_hid * mask)      # mask-then-tanh (matches module)
            h_scratch[...] = h + new_hid * alpha_ref[depth]
            return carry

        # num_layers is small & static -> fully unroll for LLO scheduling.
        lax.fori_loop(0, num_layers, body, 0, unroll=True)
        out_ref[...] = h_scratch[...].astype(out_ref.dtype)

    return kernel


def rezero_encoder(tree_embedding, node_connection, node_mask,
                   w_self, w_parent, bias, alpha):
    """Pallas implementation of ReZeroEncoder.forward (returns (out, None))."""
    B, N, H = tree_embedding.shape
    num_layers = int(alpha.shape[0])

    n_pad = _round_up(N, 8)                 # sublane multiple
    h_pad = _round_up(max(H, 128), 128)     # lane-dense last dim

    # Zero-padding is semantics-preserving: padded hidden lanes have zero weights
    # and zero bias (stay zero through tanh/residual); padded nodes have mask=0
    # and point at node 0.
    h0 = jnp.zeros((B, n_pad, h_pad), jnp.float32
                   ).at[:, :N, :H].set(tree_embedding.astype(jnp.float32))
    conn3 = jnp.zeros((B, n_pad, 1), jnp.int32
                      ).at[:, :N, 0].set(node_connection.astype(jnp.int32))
    mask3 = jnp.zeros((B, n_pad, 1), jnp.float32
                      ).at[:, :N, 0].set(node_mask.astype(jnp.float32))
    ws_bf = jnp.zeros((h_pad, h_pad), jnp.bfloat16
                      ).at[:H, :H].set(w_self.astype(jnp.bfloat16))
    wp_bf = jnp.zeros((h_pad, h_pad), jnp.bfloat16
                      ).at[:H, :H].set(w_parent.astype(jnp.bfloat16))
    bias2 = jnp.zeros((1, h_pad), jnp.float32
                      ).at[0, :H].set(bias.astype(jnp.float32))

    grid_spec = pltpu.PrefetchScalarGridSpec(
        num_scalar_prefetch=1,
        grid=(B,),
        in_specs=[
            pl.BlockSpec((pl.Squeezed(), n_pad, 1),     lambda b, a: (b, 0, 0)),  # conn
            pl.BlockSpec((pl.Squeezed(), n_pad, h_pad), lambda b, a: (b, 0, 0)),  # h
            pl.BlockSpec((pl.Squeezed(), n_pad, 1),     lambda b, a: (b, 0, 0)),  # mask
            pl.BlockSpec((h_pad, h_pad),                lambda b, a: (0, 0)),     # W_self
            pl.BlockSpec((h_pad, h_pad),                lambda b, a: (0, 0)),     # W_parent
            pl.BlockSpec((1, h_pad),                    lambda b, a: (0, 0)),     # bias
        ],
        out_specs=pl.BlockSpec((pl.Squeezed(), n_pad, h_pad),
                               lambda b, a: (b, 0, 0)),
        scratch_shapes=[pltpu.VMEM((n_pad, h_pad), jnp.float32)],
    )

    out = pl.pallas_call(
        _make_kernel(num_layers, n_pad, h_pad),
        out_shape=jax.ShapeDtypeStruct((B, n_pad, h_pad), jnp.float32),
        grid_spec=grid_spec,
        compiler_params=pltpu.CompilerParams(
            dimension_semantics=("parallel",)),   # shard batch across TCs on v7x
    )(alpha.astype(jnp.float32), conn3, h0, mask3, ws_bf, wp_bf, bias2)

    return out[:, :N, :H], None


def rezero_encoder_reference(tree_embedding, node_connection, node_mask,
                             w_self, w_parent, bias, alpha):
    """Pure-JAX f32 reference mirroring the PyTorch forward."""
    h = tree_embedding.astype(jnp.float32)
    mask = node_mask.astype(jnp.float32)[:, :, None]
    idx = jnp.broadcast_to(node_connection[:, :, None], h.shape)
    for d in range(alpha.shape[0]):
        h_parent = jnp.take_along_axis(h, idx, axis=1)
        new_hid = h @ w_self + h_parent @ w_parent + bias[None, None, :]
        new_hid = new_hid * mask
        new_hid = jnp.tanh(new_hid)
        h = h + new_hid * alpha[d]
    return h


if __name__ == "__main__":
    key = jax.random.PRNGKey(0)
    B, N, H = 2, 8, 32
    num_layers = 4

    k0, k1, k2, k3, k4, k5, k6 = jax.random.split(key, 7)

    tree_embedding = jax.random.normal(k0, (B, N, H), dtype=jnp.float32)
    # parent index for each node (valid indices in [0, N))
    node_connection = jax.random.randint(k1, (B, N), minval=0, maxval=N,
                                         dtype=jnp.int32)
    node_mask = (jax.random.uniform(k2, (B, N)) > 0.2).astype(jnp.float32)

    # SingleStepTreeEncoder parameters (deterministic synthetic init)
    w_self = jax.random.normal(k3, (H, H), dtype=jnp.float32) * (1.0 / H ** 0.5)
    w_parent = jax.random.normal(k4, (H, H), dtype=jnp.float32) * (1.0 / H ** 0.5)
    bias = jax.random.normal(k5, (H,), dtype=jnp.float32) * 0.01
    # torch init of alpha is zeros (identity forward); use small nonzero values so
    # the kernel's compute is exercised.
    alpha = jax.random.normal(k6, (num_layers,), dtype=jnp.float32) * 0.1

    out, _ = rezero_encoder(tree_embedding, node_connection, node_mask,
                            w_self, w_parent, bias, alpha)
    out = jax.block_until_ready(out)

    ref = rezero_encoder_reference(tree_embedding, node_connection, node_mask,
                                   w_self, w_parent, bias, alpha)

    assert out.shape == (B, N, H)
    # Kernel feeds the MXU with bf16 operands (f32 accumulation); tolerance is
    # loosened accordingly versus the pure-f32 reference.
    max_err = float(jnp.max(jnp.abs(out - ref)))
    assert jnp.allclose(out, ref, atol=3e-2, rtol=3e-2), f"max abs err {max_err}"
    print("KERNEL_OK")
</pallas_src>

<mosaic_0001>
module attributes {stable_mosaic.version = 11 : i64} {
  func.func @kernel(%arg0: i32, %arg1: memref<4xf32, #tpu.memory_space<smem>>, %arg2: memref<1x8x1xi32, #tpu.memory_space<vmem>>, %arg3: memref<1x8x128xf32, #tpu.memory_space<vmem>>, %arg4: memref<1x8x1xf32, #tpu.memory_space<vmem>>, %arg5: memref<128x128xbf16, #tpu.memory_space<vmem>>, %arg6: memref<128x128xbf16, #tpu.memory_space<vmem>>, %arg7: memref<1x128xf32, #tpu.memory_space<vmem>>, %arg8: memref<1x8x128xf32, #tpu.memory_space<vmem>>, %arg9: memref<8x128xf32, #tpu.memory_space<vmem>>) attributes {dimension_semantics = [#tpu.dimension_semantics<parallel>], iteration_bounds = array<i64: 2>, scalar_prefetch = 1 : i64, scratch_operands = 1 : i64, tpu.core_type = #tpu.core_type<tc>, window_params = [{transform_indices = @transform_0, window_bounds = array<i64: 1, 8, 1>}, {transform_indices = @transform_1, window_bounds = array<i64: 1, 8, 128>}, {transform_indices = @transform_2, window_bounds = array<i64: 1, 8, 1>}, {pipeline_mode = #tpu.pipeline_mode<synchronous>, transform_indices = @transform_3, window_bounds = array<i64: 128, 128>}, {pipeline_mode = #tpu.pipeline_mode<synchronous>, transform_indices = @transform_4, window_bounds = array<i64: 128, 128>}, {pipeline_mode = #tpu.pipeline_mode<synchronous>, transform_indices = @transform_5, window_bounds = array<i64: 1, 128>}, {transform_indices = @transform_6, window_bounds = array<i64: 1, 8, 128>}]} {
    %c0 = arith.constant 0 : index
    %c0_0 = arith.constant 0 : index
    %c0_1 = arith.constant 0 : index
    %0 = vector.load %arg3[%c0, %c0_0, %c0_1] : memref<1x8x128xf32, #tpu.memory_space<vmem>>, vector<1x8x128xf32>
    %1 = vector.shape_cast %0 : vector<1x8x128xf32> to vector<8x128xf32>
    %c0_2 = arith.constant 0 : index
    %c0_3 = arith.constant 0 : index
    %2 = vector.load %arg9[%c0_2, %c0_3] : memref<8x128xf32, #tpu.memory_space<vmem>>, vector<8x128xf32>
    tpu.vector_store %arg9[%c0_2, %c0_3], %1 {strides = array<i32>} : memref<8x128xf32, #tpu.memory_space<vmem>>, vector<8x128xf32>,
    %3 = tpu.iota {dimensions = array<i32: 1>} : vector<8x8xi32>
    %c0_4 = arith.constant 0 : index
    %c0_5 = arith.constant 0 : index
    %c0_6 = arith.constant 0 : index
    %4 = vector.load %arg2[%c0_4, %c0_5, %c0_6] : memref<1x8x1xi32, #tpu.memory_space<vmem>>, vector<1x8x1xi32>
    %5 = vector.shape_cast %4 : vector<1x8x1xi32> to vector<8x1xi32>
    %6 = vector.broadcast %5 : vector<8x1xi32> to vector<8x8xi32>
    %7 = arith.cmpi eq, %3, %6 : vector<8x8xi32>
    %8 = arith.extui %7 : vector<8x8xi1> to vector<8x8xi32>
    %9 = arith.sitofp %8 : vector<8x8xi32> to vector<8x8xf32>
    %10 = arith.truncf %9 : vector<8x8xf32> to vector<8x8xbf16>
    %c0_7 = arith.constant 0 : index
    %c0_8 = arith.constant 0 : index
    %11 = vector.load %arg5[%c0_7, %c0_8] : memref<128x128xbf16, #tpu.memory_space<vmem>>, vector<128x128xbf16>
    %c0_9 = arith.constant 0 : index
    %c0_10 = arith.constant 0 : index
    %12 = vector.load %arg6[%c0_9, %c0_10] : memref<128x128xbf16, #tpu.memory_space<vmem>>, vector<128x128xbf16>
    %c0_11 = arith.constant 0 : index
    %c0_12 = arith.constant 0 : index
    %c0_13 = arith.constant 0 : index
    %13 = vector.load %arg4[%c0_11, %c0_12, %c0_13] : memref<1x8x1xf32, #tpu.memory_space<vmem>>, vector<1x8x1xf32>
    %14 = vector.shape_cast %13 : vector<1x8x1xf32> to vector<8x1xf32>
    %c0_14 = arith.constant 0 : index
    %c0_15 = arith.constant 0 : index
    %15 = vector.load %arg7[%c0_14, %c0_15] : memref<1x128xf32, #tpu.memory_space<vmem>>, vector<1x128xf32>
    %16 = vector.shape_cast %15 : vector<1x128xf32> to vector<1x128xf32>
    %17 = vector.broadcast %16 : vector<1x128xf32> to vector<8x128xf32>
    %c0_i32 = arith.constant 0 : i32
    %c0_16 = arith.constant 0 : index
    %c0_17 = arith.constant 0 : index
    %18 = vector.load %arg9[%c0_16, %c0_17] : memref<8x128xf32, #tpu.memory_space<vmem>>, vector<8x128xf32>
    %19 = arith.truncf %18 : vector<8x128xf32> to vector<8x128xbf16>
    %cst = arith.constant dense<0.000000e+00> : vector<8x128xf32>
    %20 = tpu.matmul %10, %19, %cst {dimension_numbers = #tpu.dot_dimension_numbers<[1], [0], [0], [1], [0, 0, 1, 1], [], []>} : vector<8x8xbf16>, vector<8x128xbf16>, vector<8x128xf32> -> vector<8x128xf32>
    %21 = arith.truncf %20 : vector<8x128xf32> to vector<8x128xbf16>
    %cst_18 = arith.constant dense<0.000000e+00> : vector<8x128xf32>
    %22 = tpu.matmul %19, %11, %cst_18 {dimension_numbers = #tpu.dot_dimension_numbers<[1], [0], [0], [1], [0, 0, 1, 1], [], []>} : vector<8x128xbf16>, vector<128x128xbf16>, vector<8x128xf32> -> vector<8x128xf32>
    %cst_19 = arith.constant dense<0.000000e+00> : vector<8x128xf32>
    %23 = tpu.matmul %21, %12, %cst_19 {dimension_numbers = #tpu.dot_dimension_numbers<[1], [0], [0], [1], [0, 0, 1, 1], [], []>} : vector<8x128xbf16>, vector<128x128xbf16>, vector<8x128xf32> -> vector<8x128xf32>
    %24 = arith.addf %22, %23 : vector<8x128xf32>
    %25 = arith.addf %24, %17 : vector<8x128xf32>
    %26 = vector.broadcast %14 : vector<8x1xf32> to vector<8x128xf32>
    %27 = arith.mulf %25, %26 : vector<8x128xf32>
    %28 = math.tanh %27 : vector<8x128xf32>
    %29 = arith.index_cast %c0_i32 : i32 to index
    %30 = memref.load %arg1[%29] : memref<4xf32, #tpu.memory_space<smem>>
    %31 = vector.broadcast %30 : f32 to vector<8x128xf32>
    %32 = arith.mulf %28, %31 : vector<8x128xf32>
    %33 = arith.addf %18, %32 : vector<8x128xf32>
    %c0_20 = arith.constant 0 : index
    %c0_21 = arith.constant 0 : index
    %34 = vector.load %arg9[%c0_20, %c0_21] : memref<8x128xf32, #tpu.memory_space<vmem>>, vector<8x128xf32>
    tpu.vector_store %arg9[%c0_20, %c0_21], %33 {strides = array<i32>} : memref<8x128xf32, #tpu.memory_space<vmem>>, vector<8x128xf32>,
    %c1_i32 = arith.constant 1 : i32
    %c0_22 = arith.constant 0 : index
    %c0_23 = arith.constant 0 : index
    %35 = vector.load %arg9[%c0_22, %c0_23] : memref<8x128xf32, #tpu.memory_space<vmem>>, vector<8x128xf32>
    %36 = arith.truncf %35 : vector<8x128xf32> to vector<8x128xbf16>
    %cst_24 = arith.constant dense<0.000000e+00> : vector<8x128xf32>
    %37 = tpu.matmul %10, %36, %cst_24 {dimension_numbers = #tpu.dot_dimension_numbers<[1], [0], [0], [1], [0, 0, 1, 1], [], []>} : vector<8x8xbf16>, vector<8x128xbf16>, vector<8x128xf32> -> vector<8x128xf32>
    %38 = arith.truncf %37 : vector<8x128xf32> to vector<8x128xbf16>
    %cst_25 = arith.constant dense<0.000000e+00> : vector<8x128xf32>
    %39 = tpu.matmul %36, %11, %cst_25 {dimension_numbers = #tpu.dot_dimension_numbers<[1], [0], [0], [1], [0, 0, 1, 1], [], []>} : vector<8x128xbf16>, vector<128x128xbf16>, vector<8x128xf32> -> vector<8x128xf32>
    %cst_26 = arith.constant dense<0.000000e+00> : vector<8x128xf32>
    %40 = tpu.matmul %38, %12, %cst_26 {dimension_numbers = #tpu.dot_dimension_numbers<[1], [0], [0], [1], [0, 0, 1, 1], [], []>} : vector<8x128xbf16>, vector<128x128xbf16>, vector<8x128xf32> -> vector<8x128xf32>
    %41 = arith.addf %39, %40 : vector<8x128xf32>
    %42 = arith.addf %41, %17 : vector<8x128xf32>
    %43 = vector.broadcast %14 : vector<8x1xf32> to vector<8x128xf32>
    %44 = arith.mulf %42, %43 : vector<8x128xf32>
    %45 = math.tanh %44 : vector<8x128xf32>
    %46 = arith.index_cast %c1_i32 : i32 to index
    %47 = memref.load %arg1[%46] : memref<4xf32, #tpu.memory_space<smem>>
    %48 = vector.broadcast %47 : f32 to vector<8x128xf32>
    %49 = arith.mulf %45, %48 : vector<8x128xf32>
    %50 = arith.addf %35, %49 : vector<8x128xf32>
    %c0_27 = arith.constant 0 : index
    %c0_28 = arith.constant 0 : index
    %51 = vector.load %arg9[%c0_27, %c0_28] : memref<8x128xf32, #tpu.memory_space<vmem>>, vector<8x128xf32>
    tpu.vector_store %arg9[%c0_27, %c0_28], %50 {strides = array<i32>} : memref<8x128xf32, #tpu.memory_space<vmem>>, vector<8x128xf32>,
    %c2_i32 = arith.constant 2 : i32
    %c0_29 = arith.constant 0 : index
    %c0_30 = arith.constant 0 : index
    %52 = vector.load %arg9[%c0_29, %c0_30] : memref<8x128xf32, #tpu.memory_space<vmem>>, vector<8x128xf32>
    %53 = arith.truncf %52 : vector<8x128xf32> to vector<8x128xbf16>
    %cst_31 = arith.constant dense<0.000000e+00> : vector<8x128xf32>
    %54 = tpu.matmul %10, %53, %cst_31 {dimension_numbers = #tpu.dot_dimension_numbers<[1], [0], [0], [1], [0, 0, 1, 1], [], []>} : vector<8x8xbf16>, vector<8x128xbf16>, vector<8x128xf32> -> vector<8x128xf32>
    %55 = arith.truncf %54 : vector<8x128xf32> to vector<8x128xbf16>
    %cst_32 = arith.constant dense<0.000000e+00> : vector<8x128xf32>
    %56 = tpu.matmul %53, %11, %cst_32 {dimension_numbers = #tpu.dot_dimension_numbers<[1], [0], [0], [1], [0, 0, 1, 1], [], []>} : vector<8x128xbf16>, vector<128x128xbf16>, vector<8x128xf32> -> vector<8x128xf32>
    %cst_33 = arith.constant dense<0.000000e+00> : vector<8x128xf32>
    %57 = tpu.matmul %55, %12, %cst_33 {dimension_numbers = #tpu.dot_dimension_numbers<[1], [0], [0], [1], [0, 0, 1, 1], [], []>} : vector<8x128xbf16>, vector<128x128xbf16>, vector<8x128xf32> -> vector<8x128xf32>
    %58 = arith.addf %56, %57 : vector<8x128xf32>
    %59 = arith.addf %58, %17 : vector<8x128xf32>
    %60 = vector.broadcast %14 : vector<8x1xf32> to vector<8x128xf32>
    %61 = arith.mulf %59, %60 : vector<8x128xf32>
    %62 = math.tanh %61 : vector<8x128xf32>
    %63 = arith.index_cast %c2_i32 : i32 to index
    %64 = memref.load %arg1[%63] : memref<4xf32, #tpu.memory_space<smem>>
    %65 = vector.broadcast %64 : f32 to vector<8x128xf32>
    %66 = arith.mulf %62, %65 : vector<8x128xf32>
    %67 = arith.addf %52, %66 : vector<8x128xf32>
    %c0_34 = arith.constant 0 : index
    %c0_35 = arith.constant 0 : index
    %68 = vector.load %arg9[%c0_34, %c0_35] : memref<8x128xf32, #tpu.memory_space<vmem>>, vector<8x128xf32>
    tpu.vector_store %arg9[%c0_34, %c0_35], %67 {strides = array<i32>} : memref<8x128xf32, #tpu.memory_space<vmem>>, vector<8x128xf32>,
    %c3_i32 = arith.constant 3 : i32
    %c0_36 = arith.constant 0 : index
    %c0_37 = arith.constant 0 : index
    %69 = vector.load %arg9[%c0_36, %c0_37] : memref<8x128xf32, #tpu.memory_space<vmem>>, vector<8x128xf32>
    %70 = arith.truncf %69 : vector<8x128xf32> to vector<8x128xbf16>
    %cst_38 = arith.constant dense<0.000000e+00> : vector<8x128xf32>
    %71 = tpu.matmul %10, %70, %cst_38 {dimension_numbers = #tpu.dot_dimension_numbers<[1], [0], [0], [1], [0, 0, 1, 1], [], []>} : vector<8x8xbf16>, vector<8x128xbf16>, vector<8x128xf32> -> vector<8x128xf32>
    %72 = arith.truncf %71 : vector<8x128xf32> to vector<8x128xbf16>
    %cst_39 = arith.constant dense<0.000000e+00> : vector<8x128xf32>
    %73 = tpu.matmul %70, %11, %cst_39 {dimension_numbers = #tpu.dot_dimension_numbers<[1], [0], [0], [1], [0, 0, 1, 1], [], []>} : vector<8x128xbf16>, vector<128x128xbf16>, vector<8x128xf32> -> vector<8x128xf32>
    %cst_40 = arith.constant dense<0.000000e+00> : vector<8x128xf32>
    %74 = tpu.matmul %72, %12, %cst_40 {dimension_numbers = #tpu.dot_dimension_numbers<[1], [0], [0], [1], [0, 0, 1, 1], [], []>} : vector<8x128xbf16>, vector<128x128xbf16>, vector<8x128xf32> -> vector<8x128xf32>
    %75 = arith.addf %73, %74 : vector<8x128xf32>
    %76 = arith.addf %75, %17 : vector<8x128xf32>
    %77 = vector.broadcast %14 : vector<8x1xf32> to vector<8x128xf32>
    %78 = arith.mulf %76, %77 : vector<8x128xf32>
    %79 = math.tanh %78 : vector<8x128xf32>
    %80 = arith.index_cast %c3_i32 : i32 to index
    %81 = memref.load %arg1[%80] : memref<4xf32, #tpu.memory_space<smem>>
    %82 = vector.broadcast %81 : f32 to vector<8x128xf32>
    %83 = arith.mulf %79, %82 : vector<8x128xf32>
    %84 = arith.addf %69, %83 : vector<8x128xf32>
    %c0_41 = arith.constant 0 : index
    %c0_42 = arith.constant 0 : index
    %85 = vector.load %arg9[%c0_41, %c0_42] : memref<8x128xf32, #tpu.memory_space<vmem>>, vector<8x128xf32>
    tpu.vector_store %arg9[%c0_41, %c0_42], %84 {strides = array<i32>} : memref<8x128xf32, #tpu.memory_space<vmem>>, vector<8x128xf32>,
    %c4_i32 = arith.constant 4 : i32
    %c0_43 = arith.constant 0 : index
    %c0_44 = arith.constant 0 : index
    %86 = vector.load %arg9[%c0_43, %c0_44] : memref<8x128xf32, #tpu.memory_space<vmem>>, vector<8x128xf32>
    %c0_45 = arith.constant 0 : index
    %c0_46 = arith.constant 0 : index
    %c0_47 = arith.constant 0 : index
    %87 = vector.load %arg8[%c0_45, %c0_46, %c0_47] : memref<1x8x128xf32, #tpu.memory_space<vmem>>, vector<1x8x128xf32>
    %88 = vector.shape_cast %87 : vector<1x8x128xf32> to vector<8x128xf32>
    %89 = vector.shape_cast %86 : vector<8x128xf32> to vector<1x8x128xf32>
    tpu.vector_store %arg8[%c0_45, %c0_46, %c0_47], %89 {strides = array<i32>} : memref<1x8x128xf32, #tpu.memory_space<vmem>>, vector<1x8x128xf32>,
    return
  }
  func.func @transform_0(%arg0: i32, %arg1: memref<4xf32, #tpu.memory_space<smem>>) -> (i32, i32, i32) {
    %c0_i32 = arith.constant 0 : i32
    %c0_i32_0 = arith.constant 0 : i32
    %c0_i32_1 = arith.constant 0 : i32
    return %arg0, %c0_i32, %c0_i32_0 : i32, i32, i32
  }
  func.func @transform_1(%arg0: i32, %arg1: memref<4xf32, #tpu.memory_space<smem>>) -> (i32, i32, i32) {
    %c0_i32 = arith.constant 0 : i32
    %c0_i32_0 = arith.constant 0 : i32
    %c0_i32_1 = arith.constant 0 : i32
    return %arg0, %c0_i32, %c0_i32_0 : i32, i32, i32
  }
  func.func @transform_2(%arg0: i32, %arg1: memref<4xf32, #tpu.memory_space<smem>>) -> (i32, i32, i32) {
    %c0_i32 = arith.constant 0 : i32
    %c0_i32_0 = arith.constant 0 : i32
    %c0_i32_1 = arith.constant 0 : i32
    return %arg0, %c0_i32, %c0_i32_0 : i32, i32, i32
  }
  func.func @transform_3(%arg0: i32, %arg1: memref<4xf32, #tpu.memory_space<smem>>) -> (i32, i32) {
    %c0_i32 = arith.constant 0 : i32
    %c0_i32_0 = arith.constant 0 : i32
    %c0_i32_1 = arith.constant 0 : i32
    return %c0_i32, %c0_i32_0 : i32, i32
  }
  func.func @transform_4(%arg0: i32, %arg1: memref<4xf32, #tpu.memory_space<smem>>) -> (i32, i32) {
    %c0_i32 = arith.constant 0 : i32
    %c0_i32_0 = arith.constant 0 : i32
    %c0_i32_1 = arith.constant 0 : i32
    return %c0_i32, %c0_i32_0 : i32, i32
  }
  func.func @transform_5(%arg0: i32, %arg1: memref<4xf32, #tpu.memory_space<smem>>) -> (i32, i32) {
    %c0_i32 = arith.constant 0 : i32
    %c0_i32_0 = arith.constant 0 : i32
    %c0_i32_1 = arith.constant 0 : i32
    return %c0_i32, %c0_i32_0 : i32, i32
  }
  func.func @transform_6(%arg0: i32, %arg1: memref<4xf32, #tpu.memory_space<smem>>) -> (i32, i32, i32) {
    %c0_i32 = arith.constant 0 : i32
    %c0_i32_0 = arith.constant 0 : i32
    %c0_i32_1 = arith.constant 0 : i32
    return %arg0, %c0_i32, %c0_i32_0 : i32, i32, i32
  }
}

</mosaic_0001>

<bundles_post_ra>
// kernel: tpu_custom_call.1
= control target key start
LH: loop header
LB: loop body
LE: loop exit
PB: predicated region body
PF: predicated region fallthrough
CT: control target
= control target key end

     0   :  { %s2135_s0 = inlined_call_operand.vmem [shape: f32[4], index: 0, kind: input, shape index: {}]   ;;  %s2136_s1 = inlined_call_operand.vmem [shape: s32[2,8,1], index: 1, kind: input, shape index: {}]   ;;  %s2137_s2 = inlined_call_operand.vmem [shape: f32[2,8,128], index: 2, kind: input, shape index: {}]   ;;  %s2138_s3 = inlined_call_operand.vmem [shape: f32[2,8,1], index: 3, kind: input, shape index: {}]   ;;  %s2139_s4 = inlined_call_operand.hbm [shape: bf16[128,128], index: 4, kind: input, shape index: {}]   ;;  %s2140_s5 = inlined_call_operand.hbm [shape: bf16[128,128], index: 5, kind: input, shape index: {}]   ;;  %s2141_s6 = inlined_call_operand.vmem [shape: f32[1,128], index: 6, kind: input, shape index: {}]   ;;  %s2142_s7 = inlined_call_operand.hbm [shape: f32[2,8,128], index: 7, kind: output, shape index: {}]  }
   0x1   :  { %s12_s26 = sshll.u32 %s2135_s0, 4  ;;  %s13_s26 = int_to_ptr.vmem [resolvable:$true] %s12_s26 }
   0x2   :  { %s1530_s27 = scalar_lea.vmem %s13_s26, 16  ;;  %p1535_p1 = scmp.lt.s32.totalorder %s13_s26, %s13_s26 }
   0x3   :  { %p1531_p0 = scmp.ne.s32.totalorder %s13_s26, %s1530_s27  ;;  %p1536_p2 = scmp.lt.s32.totalorder %s1530_s27, %s1530_s27 }
   0x5   :  { %p1537_p3 = por %p1536_p2, %p1535_p1 }
   0x7   :  { %p1538_p4 = pnand %p1537_p3, %p1531_p0 }
   0x9   :  { %1541 = shalt.err (!%p1538_p4)  }
   0xa   :  { %s1672_s28 = smov [#allocation4]  }
   0xb   :  { %15 = dma.vmem_to_smem %s13_s26, 16, %s1672_s28, [#allocation3] }
   0xc   :  { %1642 = dma.done.wait [#allocation3], 16 }
   0xd   :  { %1643 = vsyncadd [#allocation3], 4294967280 }
   0xe   :  { %17 = sfence }
   0xf   :  { %18 = vsyncpa [#allocation6], 0 }
  0x10   :  { %19 = vsyncpa [#allocation9], 0 }
  0x11   :  { %20 = vsyncpa [#allocation7], 0 }
  0x12   :  { %22 = vsyncpa [#allocation7 + $0x1], 0  ;;  %s1724_s29 = smov 0   ;;  %s1726_s0 = smov 0  }
  0x13   :  { %s1728_s30 = smov 0   ;;  %s1730_s8 = smov 0  }
  0x14 LB: > { %s1745_s9 = sadd.s32 4294967295, %s1670_s8   ;;  %s1134_s10 = sadd.s32 4294967294, %s1670_s8   ;;  %s1670_s8 = sphi %s1730_s8, %s2160_s8   ;;  %s1666_s30 = sphi %s1728_s30, %s2159_s30   ;;  %s1662_s0 = sphi %s1726_s0, %s2158_s0   ;;  %s1658_s29 = sphi %s1724_s29, %s2157_s29  }
  0x15   : > { %s1749_s11 = sadd.s32 1, %s1670_s8   ;;  %s176_s12 = sadd.s32 1, %s1666_s30 }
  0x16   : > { %s173_s13 = ssub.s32 %s1670_s8, %s1749_s11  ;;  %p186_p5 = scmp.ne.s32.totalorder %s1666_s30, %s1662_s0 }
  0x17   : > { %p174_p6 = scmp.eq.s32.totalorder %s173_s13, 0  ;;  %p187_p7 = scmp.eq.s32.totalorder %s1745_s9, 1 }
  0x18   : > { %p192_p8 = scmp.ne.s32.totalorder %s1662_s0, %s1658_s29  ;;  %p193_p9 = scmp.eq.s32.totalorder %s1134_s10, 1 }
  0x19   : > { %s1760_s14 = scalar_select %p174_p6, %s1666_s30, %s176_s12  }
  0x1a   : > { %p1762_p10 = por %p187_p7, %p186_p5  ;;  %p1766_p11 = por %p193_p9, %p192_p8 }
  0x1b   : > { %p1135_p12 = scmp.ge.s32.totalorder %s1670_s8, 1  ;;  %p200_p13 = scmp.lt.s32.totalorder %s1670_s8, 3 }
  0x1c   : > { %s2146_s15 = scalar_select %p1762_p10, 1, 0 }
  0x1d   : > { %s2147_s16 = scalar_select %p1766_p11, 1, 0 }
  0x1e   : > { %p2143_p0 = scmp.eq.s32.totalorder %s1745_s9, 0  ;;  %p1773_p1 = pnand %p1135_p12, %p200_p13 }
  0x1f   : > { %s1673_s18 = smov [#allocation5]   ;;  %s1674_s21 = smov [#allocation8]  }
  0x20   : > { %s2148_s17 = scalar_select %p1773_p1, 1, 0 }
  0x21   : > { %s212_s19 = sshll.u32 %s1673_s18, 4  ;;  %p1449_p2 = pneg %p1773_p1  ;;  %s213_s19 = int_to_ptr.vmem [resolvable:$true] %s212_s19 }
  0x22   : > { %s225_s22 = sshll.u32 %s1674_s21, 4  ;;  %s1542_s25 = scalar_lea.hbm %s2139_s4, 1024  ;;  %s1785_s22 = int_to_ptr.vmem [resolvable:$true] %s225_s22 }
  0x23   : > { %p1781_p3 = pnand %p2143_p0, %p1449_p2  ;;  %p1543_p4 = scmp.ne.s32.totalorder %s2139_s4, %s1542_s25 }
  0x24   : > { %p1549_p8 = scmp.lt.u32.totalorder %s1542_s25, %s2139_s4 }
  0x25   : > { %p1544_p5 = pneg %p1781_p3 }
  0x27   : > { %p1545_p6 = pnand %p1544_p5, %p1543_p4 }
  0x29   : > { %p1546_p7 = pneg %p1545_p6 }
  0x2b   : > { %p1551_p9 = pnand %p1549_p8, %p1546_p7 }
  0x2d   : > { %1554 = shalt.err (!%p1551_p9)
}
  0x2e   : > { %s1555_s12 = scalar_lea.vmem %s213_s19, 1024  ;;  %p1563_p0 = scmp.lt.s32.totalorder %s213_s19, %s213_s19 }
  0x2f   : > { %p1556_p12 = scmp.ne.s32.totalorder %s213_s19, %s1555_s12  ;;  %p1564_p11 = scmp.lt.s32.totalorder %s1555_s12, %s1555_s12 }
  0x31   : > { %p1558_p13 = pnand %p1556_p12, %p1544_p5  ;;  %p1565_p10 = por %p1564_p11, %p1563_p0 }
  0x33   : > { %p1559_p2 = pneg %p1558_p13 }
  0x35   : > { %p1566_p1 = pnand %p1565_p10, %p1559_p2 }
  0x37   : > { %1569 = shalt.err (!%p1566_p1)
}
  0x38   : > { %s1675_s13 = smov 64   ;;  %s1676_s18 = smov 4  }
  0x39   : > { %1452 = dma.hbm_to_vmem [thread:$0]  (!%p1781_p3), %s2139_s4, 1024, %s213_s19, [#allocation6], %s1675_s13, %s1675_s13, %s1676_s18  }
  0x3a   : > { %s1570_s26 = scalar_lea.hbm %s2140_s5, 1024 }
  0x3b   : > { %p1571_p4 = scmp.ne.s32.totalorder %s2140_s5, %s1570_s26  ;;  %p1577_p0 = scmp.lt.u32.totalorder %s1570_s26, %s2140_s5 }
  0x3d   : > { %p1573_p10 = pnand %p1571_p4, %p1544_p5 }
  0x3f   : > { %p1574_p11 = pneg %p1573_p10 }
  0x41   : > { %p1579_p1 = pnand %p1577_p0, %p1574_p11 }
  0x43   : > { %1582 = shalt.err (!%p1579_p1)
}
  0x44   : > { %s1583_s19 = scalar_lea.vmem %s1785_s22, 1024  ;;  %p1591_p9 = scmp.lt.s32.totalorder %s1785_s22, %s1785_s22 }
  0x45   : > { %p1584_p6 = scmp.ne.s32.totalorder %s1785_s22, %s1583_s19  ;;  %p1592_p12 = scmp.lt.s32.totalorder %s1583_s19, %s1583_s19 }
  0x47   : > { %p1586_p7 = pnand %p1584_p6, %p1544_p5  ;;  %p1593_p13 = por %p1592_p12, %p1591_p9 }
  0x49   : > { %p1587_p8 = pneg %p1586_p7 }
  0x4b   : > { %p1594_p2 = pnand %p1593_p13, %p1587_p8 }
  0x4d   : > { %1597 = shalt.err (!%p1594_p2)
}
  0x4e   : > { %1455 = dma.hbm_to_vmem [thread:$0]  (!%p1781_p3), %s2140_s5, 1024, %s1785_s22, [#allocation9], %s1675_s13, %s1675_s13, %s1676_s18  }
  0x4f   : > { %p2150_p4 = scmp.ne.s32.totalorder %s2148_s17, 0 }
  0x50   : > { %p2151_p10 = scmp.eq.s32.totalorder (!%p2150_p4), %s1745_s9, 0 }
  0x51   : > { %265 = sbr.rel (%p2150_p4) target bundleno = 2052 (0x804), region = 44 }
  0x58   : > { %1645 = dma.done.wait (%p2151_p10), [#allocation6], 1024   ;;  %p2152_p5 = pmov %p2151_p10 }
  0x5a   : > { %1647 = vsyncadd (%p2152_p5), [#allocation6], 4294966272  ;;  %p2153_p11 = pmov %p2152_p5 }
  0x5b   : > { %p2154_p0 = pmov %p2152_p5 }
  0x5c   : > { %1649 = dma.done.wait (%p2153_p11), [#allocation9], 1024  }
  0x5d   : > { %1651 = vsyncadd (%p2154_p0), [#allocation9], 4294966272  ;;  %p306_p1 = scmp.lt.s32.totalorder %s1745_s9, 1  ;;  %v1677_v0 = vmov 0   ;;  %v1678_v1 = vmov 0.0   ;;  %vm377_vm0 = vcmask 1043456   ;;  %v321_v14 = vlaneseq }
  0x5e   : > { %1505 = vset.pattern.permute.xlu0 %v1677_v0  ;;  %1255 = vmatprep.subr.bf16.mxu0 %v1678_v1  ;;  %vm1679_vm1 = vmmov 0   ;;  %v1865_v7 = vld [vmem:[#allocation8] sm:$0xff]   ;;  %v1871_v8 = vld [vmem:[#allocation8 + $0x8] sm:$0xff]   ;;  %v1875_v9 = vld [vmem:[#allocation8 + $0x10] sm:$0xff]   ;;  %vm373_vm3 = vcmask 64512   ;;  %s606_s21 = sld [smem:[#allocation4]] }
  0x5f   : > { %s307_s17 = scalar_select %p306_p1, %s1745_s9, 1  ;;  %1261 = vmatprep.subr.bf16.mxu1 %v1678_v1  ;;  %1257 = vmatprep.mubr.msk.bf16.mxu0 %vm1679_vm1, %v1678_v1  ;;  %v1879_v10 = vld [vmem:[#allocation8 + $0x18] sm:$0xff]   ;;  %v1883_v11 = vld [vmem:[#allocation8 + $0x20] sm:$0xff]   ;;  %v1887_v12 = vld [vmem:[#allocation8 + $0x28] sm:$0xff]   ;;  %v322_v15 = vand.u32 127, %v321_v14 }
  0x60   : > { %1277 = vmatprep.mubr.msk.bf16.mxu1 %vm1679_vm1, %v1678_v1  ;;  %1262 = vmatpush3.bf16.msra.mxu1 %v1865_v7  ;;  %v1891_v13 = vld [vmem:[#allocation8 + $0x30] sm:$0xff]   ;;  %v1896_v18 = vld [vmem:[#allocation5] sm:$0xff]   ;;  %v1903_v20 = vld [vmem:[#allocation5 + $0x8] sm:$0xff]   ;;  %s1166_s23 = sld [smem:[#allocation4 + $0x1]]  ;;  %s303_s22 = sand.u32 1, %s1662_s0  }
  0x61   : > { %s1143_s20 = sshll.u32 %s307_s17, 3  ;;  %1263 = vmatprep.subr.bf16.mxu1 %v1678_v1  ;;  %v1909_v21 = vld [vmem:[#allocation5 + $0x10] sm:$0xff]   ;;  %v1913_v22 = vld [vmem:[#allocation5 + $0x18] sm:$0xff]   ;;  %v1917_v23 = vld [vmem:[#allocation5 + $0x20] sm:$0xff]   ;;  %s1168_s17 = sld [smem:[#allocation4 + $0x2]] }
  0x62   : > { %s309_s18 = scalar_lea.vmem %s2136_s1, %s1143_s20  ;;  %s317_s26 = scalar_lea.vmem %s2138_s3, %s1143_s20  ;;  %v1921_v24 = vld [vmem:[#allocation5 + $0x28] sm:$0xff]   ;;  %v1925_v25 = vld [vmem:[#allocation5 + $0x30] sm:$0xff]   ;;  %v1929_v26 = vld [vmem:[#allocation5 + $0x38] sm:$0xff]  }
  0x63   : > { %s313_s10 = scalar_lea.vmem %s2137_s2, %s1143_s20  ;;  %v323_v2 = vld [vmem:[%s309_s18] sm:$0xff]  ;;  %v1950_v27 = vld [vmem:[#allocation8 + $0x38] sm:$0xff]   ;;  %s1170_s20 = sld [smem:[#allocation4 + $0x3]] }
  0x64   : > { %v363_v3 = vld [vmem:[%s317_s26] sm:$0xff]  ;;  %325 = vperm.xlu0 %1505, %v323_v2   ;;  %1264 = vmatpush3.bf16.msra.mxu1 %v1871_v8  ;;  %v607_v46 = vstv %s606_s21  ;;  %s1142_s13 = sshll.u32 %s303_s22, 3  ;;  %s1172_s18 = sshll.u32 %s1745_s9, 7 }
  0x65   : > { %v1857_v4 = vld [vmem:[%s313_s10] sm:$0xff]  ;;  %1265 = vmatprep.subr.bf16.mxu1 %v1678_v1  ;;  %s305_s24 = scalar_lea.vmem [#allocation10], %s1142_s13  ;;  %s2093_s28 = scalar_lea.hbm %s2142_s7, %s1172_s18 }
  0x66   : > { %v372_v5 = vpack.c.bf16 %v1857_v4, %v1857_v4  ;;  %v1961_v37 = vld [vmem:[%s2141_s6] ss:$0 sm:$0xff]  ;;  %s1029_s25 = sshll.u32 %s305_s24, 4  ;;  %s1016_s10 = scalar_lea.sflag [#allocation7], %s303_s22  ;;  %s2095_s25 = int_to_ptr.vmem [resolvable:$true] %s1029_s25 }
  0x67   : > { %s1598_s12 = scalar_lea.vmem %s2095_s25, 128  ;;  %p2155_p6 = scmp.ne.s32.totalorder %s2146_s15, 0 }
  0x68   : > { %v379_v6 = vsel %vm377_vm0, %v372_v5, 0  ;;  %601 = vperm.xlu0 %1505, %v363_v3   ;;  %1266 = vmatpush3.bf16.msra.mxu1 %v1875_v9  ;;  %p1599_p3 = scmp.ne.s32.totalorder %s2095_s25, %s1598_s12  ;;  %s1680_s9 = smov [#allocation10]  }
  0x69   : > { %1256 = vmatpush3.bf16.msra.mxu0 %v379_v6  ;;  %1267 = vmatprep.subr.bf16.mxu1 %v1678_v1  ;;  %s1602_s19 = sshll.u32 %s1680_s9, 4  ;;  %s1603_s19 = int_to_ptr.vmem [resolvable:$false] %s1602_s19 }
  0x6a   : > { %1281 = vmatprep.subr.bf16.mxu0 %v1678_v1  ;;  %p1600_p7 = pnand %p1599_p3, %p2155_p6  ;;  %s1604_s21 = scalar_lea.vmem %s1603_s19, 256 }
  0x6b   : > { %p1605_p9 = scmp.lt.s32.totalorder %s2095_s25, %s1603_s19  ;;  %p1606_p12 = scmp.lt.s32.totalorder %s1604_s21, %s1598_s12 }
  0x6c   : > { %1268 = vmatpush3.bf16.msra.mxu1 %v1879_v10  ;;  %p1601_p8 = pneg %p1600_p7 }
  0x6d   : > { %1269 = vmatprep.subr.bf16.mxu1 %v1678_v1  ;;  %p1607_p13 = por %p1606_p12, %p1605_p9 }
  0x6f   : > { %p1608_p2 = pnand %p1607_p13, %p1601_p8 }
  0x70   : > { %1270 = vmatpush3.bf16.msra.mxu1 %v1883_v11 }
  0x71   : > { %1271 = vmatprep.subr.bf16.mxu1 %v1678_v1 }
  0x74   : > { %1272 = vmatpush3.bf16.msra.mxu1 %v1887_v12 }
  0x75   : > { %1273 = vmatprep.subr.bf16.mxu1 %v1678_v1 }
  0x78   : > { %1274 = vmatpush3.bf16.msra.mxu1 %v1891_v13 }
  0x79   : > { %1275 = vmatprep.subr.bf16.mxu1 %v1678_v1 }
  0x7c   : > { %1276 = vmatpush3.bf16.msra.mxu1 %v1950_v27 }
  0x7d   : > { %1301 = vmatprep.subr.bf16.mxu1 %v1678_v1 }
  0xe3   : > { %v326_v16 = vpop.permute.xlu0 %325 }
  0xe4   : > { %vm327_vm2 = vcmp.eq.s32.totalorder %v322_v15, %v326_v16 }
  0xe5   : > { %v1146_v17 = vsel %vm327_vm2, 1.0, %v1678_v1 }
  0xe6   : > { %v1898_v19 = vpack.c.bf16 %v1146_v17, %v1146_v17 }
  0xe7   : > { %v1964_v44 = vpop.permute.xlu0 %601 }
  0xe8   : > { %1258 = vmatmul.mubr.msk.bf16.vlgmr.msra.gmra.mrb[0].mxu0 %vm373_vm3, %v1898_v19 }
  0xe9   : > { %1282 = vmatpush3.bf16.msra.mxu0 %v1896_v18  ;;  %1297 = vmatprep.mubr.msk.bf16.mxu0 %vm1679_vm1, %v1678_v1 }
  0xea   : > { %1283 = vmatprep.subr.bf16.mxu0 %v1678_v1 }
  0xed   : > { %1284 = vmatpush3.bf16.msra.mxu0 %v1903_v20 }
  0xee   : > { %1285 = vmatprep.subr.bf16.mxu0 %v1678_v1 }
  0xf1   : > { %1286 = vmatpush3.bf16.msra.mxu0 %v1909_v21 }
  0xf2   : > { %1287 = vmatprep.subr.bf16.mxu0 %v1678_v1 }
  0xf5   : > { %1288 = vmatpush3.bf16.msra.mxu0 %v1913_v22 }
  0xf6   : > { %1289 = vmatprep.subr.bf16.mxu0 %v1678_v1 }
  0xf9   : > { %1290 = vmatpush3.bf16.msra.mxu0 %v1917_v23 }
  0xfa   : > { %1291 = vmatprep.subr.bf16.mxu0 %v1678_v1 }
  0xfd   : > { %1292 = vmatpush3.bf16.msra.mxu0 %v1921_v24 }
  0xfe   : > { %1293 = vmatprep.subr.bf16.mxu0 %v1678_v1 }
 0x101   : > { %1294 = vmatpush3.bf16.msra.mxu0 %v1925_v25 }
 0x102   : > { %1295 = vmatprep.subr.bf16.mxu0 %v1678_v1 }
 0x105   : > { %1296 = vmatpush3.bf16.msra.mxu0 %v1929_v26 }
 0x106   : > { %1307 = vmatprep.subr.bf16.mxu0 %v1678_v1 }
 0x108   : > { %1298 = vmatmul.mubr.bf16.vlgmr.msra.gmra.mrb[4].mxu0 %v372_v5  ;;  %v741_v5 = vstv %s1166_s23 }
 0x109   : > { %1308 = vmatpush3.bf16.msra.mxu0 %v1865_v7  ;;  %1323 = vmatprep.mubr.msk.bf16.mxu0 %vm1679_vm1, %v1678_v1 }
 0x10a   : > { %1309 = vmatprep.subr.bf16.mxu0 %v1678_v1 }
 0x10d   : > { %1310 = vmatpush3.bf16.msra.mxu0 %v1871_v8 }
 0x10e   : > { %1311 = vmatprep.subr.bf16.mxu0 %v1678_v1 }
 0x111   : > { %1312 = vmatpush3.bf16.msra.mxu0 %v1875_v9 }
 0x112   : > { %1313 = vmatprep.subr.bf16.mxu0 %v1678_v1 }
 0x115   : > { %1314 = vmatpush3.bf16.msra.mxu0 %v1879_v10 }
 0x116   : > { %1315 = vmatprep.subr.bf16.mxu0 %v1678_v1 }
 0x119   : > { %1316 = vmatpush3.bf16.msra.mxu0 %v1883_v11 }
 0x11a   : > { %1317 = vmatprep.subr.bf16.mxu0 %v1678_v1 }
 0x11d   : > { %1318 = vmatpush3.bf16.msra.mxu0 %v1887_v12 }
 0x11e   : > { %1319 = vmatprep.subr.bf16.mxu0 %v1678_v1 }
 0x121   : > { %1320 = vmatpush3.bf16.msra.mxu0 %v1891_v13 }
 0x122   : > { %1321 = vmatprep.subr.bf16.mxu0 %v1678_v1 }
 0x125   : > { %1322 = vmatpush3.bf16.msra.mxu0 %v1950_v27 }
 0x126   : > { %1347 = vmatprep.subr.bf16.mxu0 %v1678_v1 }
 0x1bb   : > { %v415_v28 = vpop.f32.mrb[0].mxu0 }
 0x1bc   : > { %v421_v29 = vpack.c.bf16 %v415_v28, %v415_v28  ;;  %v1259_v30 = vpop.f32.mrb[1].mxu0 }
 0x1bd   : > { %v418_v31 = vpop.f32.mrb[2].mxu0 }
 0x1be   : > { %v1260_v32 = vpop.f32.mrb[3].mxu0  ;;  %1278 = vmatmul.mubr.bf16.vlgmr.msra.gmra.mrb[0].mxu1 %v421_v29 }
 0x1bf   : > { %1303 = vmatprep.mubr.msk.bf16.mxu1 %vm1679_vm1, %v1678_v1 }
 0x1db   : > { %v592_v33 = vpop.f32.mrb[4].mxu0 }
 0x1dc   : > { %v1299_v34 = vpop.f32.mrb[5].mxu0 }
 0x1dd   : > { %v595_v35 = vpop.f32.mrb[6].mxu0 }
 0x1de   : > { %v1300_v36 = vpop.f32.mrb[7].mxu0 }
 0x1df   : > { %v875_v36 = vstv %s1168_s17 }
 0x291   : > { %v504_v38 = vpop.f32.mrb[0].mxu1 }
 0x292   : > { %v593_v39 = vadd.f32 %v592_v33, %v504_v38  ;;  %v1279_v40 = vpop.f32.mrb[1].mxu1 }
 0x293   : > { %v507_v41 = vpop.f32.mrb[2].mxu1 }
 0x294   : > { %v598_v42 = vadd.f32 %v1961_v37, %v593_v39  ;;  %v1280_v43 = vpop.f32.mrb[3].mxu1 }
 0x296   : > { %v604_v45 = vmul.f32 %v1964_v44, %v598_v42 }
 0x298   : > { %1522 = vtanh.f32 %v604_v45 }
 0x2a2   : > { %v1523_v47 = vpop.eup %1522 }
 0x2a3   : > { %v608_v48 = vmul.f32 %v1523_v47, %v607_v46 }
 0x2a5   : > { %v1968_v49 = vadd.f32 %v608_v48, %v1857_v4 }
 0x2a7   : > { %v612_v50 = vpack.c.bf16 %v1968_v49, %v1968_v49 }
 0x2a9   : > { %v614_v51 = vsel %vm377_vm0, %v612_v50, 0 }
 0x2aa   : > { %1302 = vmatpush3.bf16.msra.mxu1 %v614_v51 }
 0x2ab   : > { %1327 = vmatprep.subr.bf16.mxu1 %v1678_v1 }
 0x2ad   : > { %1304 = vmatmul.mubr.msk.bf16.vlgmr.msra.gmra.mrb[4].mxu1 %vm373_vm3, %v1898_v19 }
 0x2ae   : > { %1328 = vmatpush3.bf16.msra.mxu1 %v1896_v18  ;;  %1343 = vmatprep.mubr.msk.bf16.mxu1 %vm1679_vm1, %v1678_v1 }
 0x2af   : > { %1329 = vmatprep.subr.bf16.mxu1 %v1678_v1 }
 0x2b2   : > { %1330 = vmatpush3.bf16.msra.mxu1 %v1903_v20 }
 0x2b3   : > { %1331 = vmatprep.subr.bf16.mxu1 %v1678_v1 }
 0x2b6   : > { %1332 = vmatpush3.bf16.msra.mxu1 %v1909_v21 }
 0x2b7   : > { %1333 = vmatprep.subr.bf16.mxu1 %v1678_v1 }
 0x2ba   : > { %1334 = vmatpush3.bf16.msra.mxu1 %v1913_v22 }
 0x2bb   : > { %1335 = vmatprep.subr.bf16.mxu1 %v1678_v1 }
 0x2be   : > { %1336 = vmatpush3.bf16.msra.mxu1 %v1917_v23 }
 0x2bf   : > { %1337 = vmatprep.subr.bf16.mxu1 %v1678_v1 }
 0x2c2   : > { %1338 = vmatpush3.bf16.msra.mxu1 %v1921_v24 }
 0x2c3   : > { %1339 = vmatprep.subr.bf16.mxu1 %v1678_v1 }
 0x2c6   : > { %1340 = vmatpush3.bf16.msra.mxu1 %v1925_v25 }
 0x2c7   : > { %1341 = vmatprep.subr.bf16.mxu1 %v1678_v1 }
 0x2ca   : > { %1342 = vmatpush3.bf16.msra.mxu1 %v1929_v26 }
 0x2cb   : > { %1353 = vmatprep.subr.bf16.mxu1 %v1678_v1 }
 0x2cd   : > { %1344 = vmatmul.mubr.bf16.vlgmr.msra.gmra.mrb[8].mxu1 %v612_v50  ;;  %v1009_v50 = vstv %s1170_s20 }
 0x2ce   : > { %1354 = vmatpush3.bf16.msra.mxu1 %v1865_v7  ;;  %1369 = vmatprep.mubr.msk.bf16.mxu1 %vm1679_vm1, %v1678_v1 }
 0x2cf   : > { %1355 = vmatprep.subr.bf16.mxu1 %v1678_v1 }
 0x2d2   : > { %1356 = vmatpush3.bf16.msra.mxu1 %v1871_v8 }
 0x2d3   : > { %1357 = vmatprep.subr.bf16.mxu1 %v1678_v1 }
 0x2d6   : > { %1358 = vmatpush3.bf16.msra.mxu1 %v1875_v9 }
 0x2d7   : > { %1359 = vmatprep.subr.bf16.mxu1 %v1678_v1 }
 0x2da   : > { %1360 = vmatpush3.bf16.msra.mxu1 %v1879_v10 }
 0x2db   : > { %1361 = vmatprep.subr.bf16.mxu1 %v1678_v1 }
 0x2de   : > { %1362 = vmatpush3.bf16.msra.mxu1 %v1883_v11 }
 0x2df   : > { %1363 = vmatprep.subr.bf16.mxu1 %v1678_v1 }
 0x2e2   : > { %1364 = vmatpush3.bf16.msra.mxu1 %v1887_v12 }
 0x2e3   : > { %1365 = vmatprep.subr.bf16.mxu1 %v1678_v1 }
 0x2e6   : > { %1366 = vmatpush3.bf16.msra.mxu1 %v1891_v13 }
 0x2e7   : > { %1367 = vmatprep.subr.bf16.mxu1 %v1678_v1 }
 0x2ea   : > { %1368 = vmatpush3.bf16.msra.mxu1 %v1950_v27 }
 0x2eb   : > { %1393 = vmatprep.subr.bf16.mxu1 %v1678_v1 }
 0x380   : > { %v650_v52 = vpop.f32.mrb[4].mxu1 }
 0x381   : > { %v656_v53 = vpack.c.bf16 %v650_v52, %v650_v52  ;;  %v1305_v54 = vpop.f32.mrb[5].mxu1 }
 0x382   : > { %v653_v55 = vpop.f32.mrb[6].mxu1 }
 0x383   : > { %v1306_v56 = vpop.f32.mrb[7].mxu1  ;;  %1324 = vmatmul.mubr.bf16.vlgmr.msra.gmra.mrb[8].mxu0 %v656_v53 }
 0x384   : > { %1349 = vmatprep.mubr.msk.bf16.mxu0 %vm1679_vm1, %v1678_v1 }
 0x3a0   : > { %v731_v57 = vpop.f32.mrb[8].mxu1 }
 0x3a1   : > { %v1345_v58 = vpop.f32.mrb[9].mxu1 }
 0x3a2   : > { %v734_v59 = vpop.f32.mrb[10].mxu1 }
 0x3a3   : > { %v1346_v60 = vpop.f32.mrb[11].mxu1 }
 0x456   : > { %v691_v61 = vpop.f32.mrb[8].mxu0 }
 0x457   : > { %v732_v62 = vadd.f32 %v731_v57, %v691_v61  ;;  %v1325_v63 = vpop.f32.mrb[9].mxu0 }
 0x458   : > { %v694_v0 = vpop.f32.mrb[10].mxu0 }
 0x459   : > { %v737_v2 = vadd.f32 %v1961_v37, %v732_v62  ;;  %v1326_v3 = vpop.f32.mrb[11].mxu0 }
 0x45b   : > { %v738_v4 = vmul.f32 %v737_v2, %v1964_v44 }
 0x45d   : > { %1524 = vtanh.f32 %v738_v4 }
 0x467   : > { %v1525_v6 = vpop.eup %1524 }
 0x468   : > { %v742_v14 = vmul.f32 %v1525_v6, %v741_v5 }
 0x46a   : > { %v2017_v15 = vadd.f32 %v742_v14, %v1968_v49 }
 0x46c   : > { %v746_v16 = vpack.c.bf16 %v2017_v15, %v2017_v15 }
 0x46e   : > { %v748_v17 = vsel %vm377_vm0, %v746_v16, 0 }
 0x46f   : > { %1348 = vmatpush3.bf16.msra.mxu0 %v748_v17 }
 0x470   : > { %1373 = vmatprep.subr.bf16.mxu0 %v1678_v1 }
 0x472   : > { %1350 = vmatmul.mubr.msk.bf16.vlgmr.msra.gmra.mrb[12].mxu0 %vm373_vm3, %v1898_v19 }
 0x473   : > { %1374 = vmatpush3.bf16.msra.mxu0 %v1896_v18  ;;  %1389 = vmatprep.mubr.msk.bf16.mxu0 %vm1679_vm1, %v1678_v1 }
 0x474   : > { %1375 = vmatprep.subr.bf16.mxu0 %v1678_v1 }
 0x477   : > { %1376 = vmatpush3.bf16.msra.mxu0 %v1903_v20 }
 0x478   : > { %1377 = vmatprep.subr.bf16.mxu0 %v1678_v1 }
 0x47b   : > { %1378 = vmatpush3.bf16.msra.mxu0 %v1909_v21 }
 0x47c   : > { %1379 = vmatprep.subr.bf16.mxu0 %v1678_v1 }
 0x47f   : > { %1380 = vmatpush3.bf16.msra.mxu0 %v1913_v22 }
 0x480   : > { %1381 = vmatprep.subr.bf16.mxu0 %v1678_v1 }
 0x483   : > { %1382 = vmatpush3.bf16.msra.mxu0 %v1917_v23 }
 0x484   : > { %1383 = vmatprep.subr.bf16.mxu0 %v1678_v1 }
 0x487   : > { %1384 = vmatpush3.bf16.msra.mxu0 %v1921_v24 }
 0x488   : > { %1385 = vmatprep.subr.bf16.mxu0 %v1678_v1 }
 0x48b   : > { %1386 = vmatpush3.bf16.msra.mxu0 %v1925_v25 }
 0x48c   : > { %1387 = vmatprep.subr.bf16.mxu0 %v1678_v1 }
 0x48f   : > { %1388 = vmatpush3.bf16.msra.mxu0 %v1929_v26 }
 0x490   : > { %1399 = vmatprep.subr.bf16.mxu0 %v1678_v1 }
 0x492   : > { %1390 = vmatmul.mubr.bf16.vlgmr.msra.gmra.mrb[16].mxu0 %v746_v16 }
 0x493   : > { %1400 = vmatpush3.bf16.msra.mxu0 %v1865_v7  ;;  %1415 = vmatprep.mubr.msk.bf16.mxu0 %vm1679_vm1, %v1678_v1 }
 0x494   : > { %1401 = vmatprep.subr.bf16.mxu0 %v1678_v1 }
 0x497   : > { %1402 = vmatpush3.bf16.msra.mxu0 %v1871_v8 }
 0x498   : > { %1403 = vmatprep.subr.bf16.mxu0 %v1678_v1 }
 0x49b   : > { %1404 = vmatpush3.bf16.msra.mxu0 %v1875_v9 }
 0x49c   : > { %1405 = vmatprep.subr.bf16.mxu0 %v1678_v1 }
 0x49f   : > { %1406 = vmatpush3.bf16.msra.mxu0 %v1879_v10 }
 0x4a0   : > { %1407 = vmatprep.subr.bf16.mxu0 %v1678_v1 }
 0x4a3   : > { %1408 = vmatpush3.bf16.msra.mxu0 %v1883_v11 }
 0x4a4   : > { %1409 = vmatprep.subr.bf16.mxu0 %v1678_v1 }
 0x4a7   : > { %1410 = vmatpush3.bf16.msra.mxu0 %v1887_v12 }
 0x4a8   : > { %1411 = vmatprep.subr.bf16.mxu0 %v1678_v1 }
 0x4ab   : > { %1412 = vmatpush3.bf16.msra.mxu0 %v1891_v13 }
 0x4ac   : > { %1413 = vmatprep.subr.bf16.mxu0 %v1678_v1 }
 0x4af   : > { %1414 = vmatpush3.bf16.msra.mxu0 %v1950_v27 }
 0x545   : > { %v784_v7 = vpop.f32.mrb[12].mxu0 }
 0x546   : > { %v790_v8 = vpack.c.bf16 %v784_v7, %v784_v7  ;;  %v1351_v9 = vpop.f32.mrb[13].mxu0 }
 0x547   : > { %v787_v10 = vpop.f32.mrb[14].mxu0 }
 0x548   : > { %v1352_v28 = vpop.f32.mrb[15].mxu0  ;;  %1370 = vmatmul.mubr.bf16.vlgmr.msra.gmra.mrb[12].mxu1 %v790_v8 }
 0x549   : > { %1395 = vmatprep.mubr.msk.bf16.mxu1 %vm1679_vm1, %v1678_v1 }
 0x565   : > { %v865_v11 = vpop.f32.mrb[16].mxu0 }
 0x566   : > { %v1391_v29 = vpop.f32.mrb[17].mxu0 }
 0x567   : > { %v868_v12 = vpop.f32.mrb[18].mxu0 }
 0x568   : > { %v1392_v30 = vpop.f32.mrb[19].mxu0 }
 0x61b   : > { %v825_v31 = vpop.f32.mrb[12].mxu1 }
 0x61c   : > { %v866_v32 = vadd.f32 %v865_v11, %v825_v31  ;;  %v1371_v13 = vpop.f32.mrb[13].mxu1 }
 0x61d   : > { %v828_v33 = vpop.f32.mrb[14].mxu1 }
 0x61e   : > { %v871_v34 = vadd.f32 %v1961_v37, %v866_v32  ;;  %v1372_v27 = vpop.f32.mrb[15].mxu1 }
 0x620   : > { %v872_v35 = vmul.f32 %v871_v34, %v1964_v44 }
 0x622   : > { %1526 = vtanh.f32 %v872_v35 }
 0x62c   : > { %v1527_v38 = vpop.eup %1526 }
 0x62d   : > { %v876_v39 = vmul.f32 %v1527_v38, %v875_v36 }
 0x62f   : > { %v877_v40 = vadd.f32 %v876_v39, %v2017_v15 }
 0x631   : > { %v880_v41 = vpack.c.bf16 %v877_v40, %v877_v40 }
 0x633   : > { %v882_v42 = vsel %vm377_vm0, %v880_v41, 0 }
 0x634   : > { %1394 = vmatpush3.bf16.msra.mxu1 %v882_v42 }
 0x635   : > { %1419 = vmatprep.subr.bf16.mxu1 %v1678_v1 }
 0x637   : > { %1396 = vmatmul.mubr.msk.bf16.vlgmr.msra.gmra.mrb[16].mxu1 %vm373_vm3, %v1898_v19 }
 0x638   : > { %1420 = vmatpush3.bf16.msra.mxu1 %v1896_v18  ;;  %1435 = vmatprep.mubr.msk.bf16.mxu1 %vm1679_vm1, %v1678_v1 }
 0x639   : > { %1421 = vmatprep.subr.bf16.mxu1 %v1678_v1 }
 0x63c   : > { %1422 = vmatpush3.bf16.msra.mxu1 %v1903_v20 }
 0x63d   : > { %1423 = vmatprep.subr.bf16.mxu1 %v1678_v1 }
 0x640   : > { %1424 = vmatpush3.bf16.msra.mxu1 %v1909_v21 }
 0x641   : > { %1425 = vmatprep.subr.bf16.mxu1 %v1678_v1 }
 0x644   : > { %1426 = vmatpush3.bf16.msra.mxu1 %v1913_v22 }
 0x645   : > { %1427 = vmatprep.subr.bf16.mxu1 %v1678_v1 }
 0x648   : > { %1428 = vmatpush3.bf16.msra.mxu1 %v1917_v23 }
 0x649   : > { %1429 = vmatprep.subr.bf16.mxu1 %v1678_v1 }
 0x64c   : > { %1430 = vmatpush3.bf16.msra.mxu1 %v1921_v24 }
 0x64d   : > { %1431 = vmatprep.subr.bf16.mxu1 %v1678_v1 }
 0x650   : > { %1432 = vmatpush3.bf16.msra.mxu1 %v1925_v25 }
 0x651   : > { %1433 = vmatprep.subr.bf16.mxu1 %v1678_v1 }
 0x654   : > { %1434 = vmatpush3.bf16.msra.mxu1 %v1929_v26 }
 0x657   : > { %1436 = vmatmul.mubr.bf16.vlgmr.msra.gmra.mrb[20].mxu1 %v880_v41 }
 0x70a   : > { %v918_v18 = vpop.f32.mrb[16].mxu1 }
 0x70b   : > { %v924_v19 = vpack.c.bf16 %v918_v18, %v918_v18  ;;  %v1397_v20 = vpop.f32.mrb[17].mxu1 }
 0x70c   : > { %v921_v21 = vpop.f32.mrb[18].mxu1 }
 0x70d   : > { %v1398_v22 = vpop.f32.mrb[19].mxu1  ;;  %1416 = vmatmul.mubr.bf16.vlgmr.msra.gmra.mrb[20].mxu0 %v924_v19 }
 0x72a   : > { %v999_v23 = vpop.f32.mrb[20].mxu1 }
 0x72b   : > { %v1437_v43 = vpop.f32.mrb[21].mxu1 }
 0x72c   : > { %v1002_v24 = vpop.f32.mrb[22].mxu1 }
 0x72d   : > { %v1438_v45 = vpop.f32.mrb[23].mxu1 }
 0x7e0   : > { %v959_v46 = vpop.f32.mrb[20].mxu0 }
 0x7e1   : > { %v1000_v47 = vadd.f32 %v999_v23, %v959_v46  ;;  %v1417_v25 = vpop.f32.mrb[21].mxu0 }
 0x7e2   : > { %v962_v48 = vpop.f32.mrb[22].mxu0 }
 0x7e3   : > { %v1005_v1 = vadd.f32 %v1961_v37, %v1000_v47  ;;  %v1418_v26 = vpop.f32.mrb[23].mxu0 }
 0x7e5   : > { %v1006_v49 = vmul.f32 %v1005_v1, %v1964_v44 }
 0x7e7   : > { %1528 = vtanh.f32 %v1006_v49 }
 0x7f1   : > { %v1529_v51 = vpop.eup %1528 }
 0x7f2   : > { %v1010_v52 = vmul.f32 %v1529_v51, %v1009_v50 }
 0x7f4   : > { %v1011_v53 = vadd.f32 %v1010_v52, %v877_v40 }
 0x7f6   : > { %1014 = vst [vmem:[%s305_s24] sm:$0xff] %v1011_v53 }
 0x7f7   : > { %1611 = shalt.err (!%p1608_p2)
}
 0x7f8   : > { %s1612_s23 = scalar_lea.hbm %s2093_s28, 128  ;;  %s1616_s22 = scalar_lea.hbm %s2142_s7, 256 }
 0x7f9   : > { %p1613_p4 = scmp.ne.s32.totalorder %s2093_s28, %s1612_s23  ;;  %p1617_p11 = scmp.lt.u32.totalorder %s2093_s28, %s2142_s7 }
 0x7fa   : > { %p1618_p0 = scmp.lt.u32.totalorder %s1616_s22, %s1612_s23  ;;  %p1620_p3 = scmp.lt.u32.totalorder %s1612_s23, %s2093_s28 }
 0x7fb   : > { %p1614_p10 = pnand %p1613_p4, %p2155_p6 }
 0x7fc   : > { %p1619_p1 = por %p1618_p0, %p1617_p11 }
 0x7fd   : > { %p1615_p5 = pneg %p1614_p10 }
 0x7fe   : > { %p1621_p7 = por %p1620_p3, %p1619_p1 }
 0x800   : > { %p1622_p8 = pnand %p1621_p7, %p1615_p5 }
 0x802   : > { %1625 = shalt.err (!%p1622_p8)
}
 0x803   : > { %1447 = dma.vmem_to_hbm [thread:$0]  (%p2155_p6), %s2095_s25, 128, %s2093_s28, %s1016_s10  }
 0x804 PF: > { %p1464_p9 = scmp.ge.s32.totalorder %s1670_s8, 2  ;;  %s1041_s24 = sand.u32 1, %s1658_s29  }
 0x805   : > { %p2156_p12 = scmp.ne.s32.totalorder %s2147_s16, 0  ;;  %s1042_s26 = scalar_lea.sflag [#allocation7], %s1041_s24 }
 0x807   : > { %p1457_p13 = pnand %p1464_p9, %p2156_p12 }
 0x809   : > { %1653 = dma.done.wait (!%p1457_p13), %s1042_s26, 128  }
 0x80a   : > { %1655 = vsyncadd (!%p1457_p13), %s1042_s26, 4294967168  ;;  %p25_p2 = scmp.ge.s32.totalorder %s1749_s11, 4   ;;  %s2157_s29 = smov %s1662_s0 }
 0x80b   : > { %s2158_s0 = smov %s1666_s30  ;;  %s2159_s30 = smov %s1760_s14 }
 0x80c   : > { %s2160_s8 = smov %s1749_s11  ;;  %27 = sbr.rel (!%p25_p2) target bundleno = 20 (0x14), region = 94 }
 0x813   :  { %1047 = vsyncpa [#allocation6], 1 }
 0x814   :  { %1049 = vsyncpa [#allocation6 + $0x1], 1 }
 0x815   :  { %1050 = vsyncpa [#allocation9], 1 }
 0x816   :  { %1051 = vsyncpa [#allocation7], 1 }
 0x817   :  { %1053 = vsyncpa [#allocation7 + $0x1], 1 }

</bundles_post_ra>
